<compile_context>
chip_gen: v7x
topology: tpu7x:2x2x1
jax: 0.10.0
libtpu: 0.0.40
codegen_flags: <defaults>
</compile_context>

<pallas_src>
import functools

import jax
import jax.numpy as jnp
from jax.experimental import pallas as pl
from jax.experimental.pallas import tpu as pltpu

_LANE = 128


def _actor_kernel(state_ref, w1_ref, b1_ref, w2_ref, b2_ref, w3_ref, b3_ref,
                  out_ref, *, action_base, max_action):
    # Layer 1: (Tb, S) @ (S, H) -> f32 acc, bias/relu in f32.
    h1 = jnp.dot(state_ref[...], w1_ref[...],
                 preferred_element_type=jnp.float32)
    h1 = jnp.maximum(h1 + b1_ref[...], 0.0)

    # Layer 2: (Tb, H) @ (H, H)
    h2 = jnp.dot(h1.astype(w2_ref.dtype), w2_ref[...],
                 preferred_element_type=jnp.float32)
    h2 = jnp.maximum(h2 + b2_ref[...], 0.0)

    # Layer 3: (Tb, H) @ (H, A_pad)  -> tanh + affine rescale, lane-dense store.
    h3 = jnp.dot(h2.astype(w3_ref.dtype), w3_ref[...],
                 preferred_element_type=jnp.float32)
    h3 = h3 + b3_ref[...]
    out_ref[...] = (action_base + max_action * jnp.tanh(h3)).astype(out_ref.dtype)


def actor_forward(state, params, action_range, *,
                  compute_dtype=jnp.float32, tile_b=256):
    """Fused Actor forward pass.

    state:  (B, state_dim) float32
    params: dict with w1 (S,H), b1 (H,), w2 (H,H), b2 (H,), w3 (H,A), b3 (A,)
            stored in (in_features, out_features) layout.
    compute_dtype: dtype fed to the MXU (jnp.float32 or jnp.bfloat16);
            accumulation is always f32.
    """
    w1, b1 = params["w1"], params["b1"]
    w2, b2 = params["w2"], params["b2"]
    w3, b3 = params["w3"], params["b3"]

    max_action = float((action_range[1] - action_range[0]) / 2)
    action_base = float((action_range[1] + action_range[0]) / 2)

    B, S = state.shape
    H = w1.shape[1]
    act_dim = w3.shape[1]

    # --- Lane-dense output: pad act_dim to a multiple of 128 -----------------
    act_pad = ((act_dim + _LANE - 1) // _LANE) * _LANE
    if act_pad != act_dim:
        w3 = jnp.pad(w3, ((0, 0), (0, act_pad - act_dim)))
        b3 = jnp.pad(b3, ((0, act_pad - act_dim),))

    # --- Batch tiling: multiples of 8 rows, capped at tile_b (default 256) ---
    if B >= tile_b:
        tb = tile_b
    else:
        tb = max(8, ((B + 7) // 8) * 8)
    B_pad = ((B + tb - 1) // tb) * tb
    if B_pad != B:
        state = jnp.pad(state, ((0, B_pad - B), (0, 0)))

    # Cast only the MXU operands; biases / epilogue stay f32.
    state_c = state.astype(compute_dtype)
    w1c = w1.astype(compute_dtype)
    w2c = w2.astype(compute_dtype)
    w3c = w3.astype(compute_dtype)
    b1r = b1.reshape(1, -1).astype(jnp.float32)
    b2r = b2.reshape(1, -1).astype(jnp.float32)
    b3r = b3.reshape(1, -1).astype(jnp.float32)

    kernel = functools.partial(_actor_kernel,
                               action_base=action_base,
                               max_action=max_action)

    grid = (B_pad // tb,)
    itemsize = jnp.dtype(compute_dtype).itemsize
    cost = pl.CostEstimate(
        flops=2 * B_pad * (S * H + H * H + H * act_pad),
        transcendentals=B_pad * act_pad,
        bytes_accessed=(B_pad * S * itemsize
                        + (S * H + H * H + H * act_pad) * itemsize
                        + (2 * H + act_pad) * 4
                        + B_pad * act_pad * 4),
    )

    out = pl.pallas_call(
        kernel,
        out_shape=jax.ShapeDtypeStruct((B_pad, act_pad), jnp.float32),
        grid_spec=pltpu.PrefetchScalarGridSpec(
            num_scalar_prefetch=0,
            grid=grid,
            in_specs=[
                pl.BlockSpec((tb, S), lambda i: (i, 0)),        # state tile
                pl.BlockSpec((S, H), lambda i: (0, 0)),         # w1 (resident)
                pl.BlockSpec((1, H), lambda i: (0, 0)),         # b1
                pl.BlockSpec((H, H), lambda i: (0, 0)),         # w2
                pl.BlockSpec((1, H), lambda i: (0, 0)),         # b2
                pl.BlockSpec((H, act_pad), lambda i: (0, 0)),   # w3 (padded)
                pl.BlockSpec((1, act_pad), lambda i: (0, 0)),   # b3 (padded)
            ],
            out_specs=pl.BlockSpec((tb, act_pad), lambda i: (i, 0)),
        ),
        compiler_params=pltpu.CompilerParams(
            dimension_semantics=("parallel",)),
        cost_estimate=cost,
    )(state_c, w1c, b1r, w2c, b2r, w3c, b3r)

    # Strip batch / lane padding outside the kernel.
    return out[:B, :act_dim]


def init_actor_params(key, state_dim, act_dim, hidden=256):
    """Deterministic synthetic parameter init (nn.Linear shapes, stored as (in, out))."""
    k1, k2, k3, k4, k5, k6 = jax.random.split(key, 6)

    def uniform(k, shape, bound):
        return jax.random.uniform(k, shape, jnp.float32, -bound, bound)

    s1 = 1.0 / jnp.sqrt(state_dim)
    s2 = 1.0 / jnp.sqrt(hidden)
    return {
        "w1": uniform(k1, (state_dim, hidden), s1),
        "b1": uniform(k2, (hidden,), s1),
        "w2": uniform(k3, (hidden, hidden), s2),
        "b2": uniform(k4, (hidden,), s2),
        "w3": uniform(k5, (hidden, act_dim), s2),
        "b3": uniform(k6, (act_dim,), s2),
    }


def actor_ref(state, params, action_range):
    """Pure-JAX reference for correctness checking."""
    max_action = float((action_range[1] - action_range[0]) / 2)
    action_base = float((action_range[1] + action_range[0]) / 2)
    a = jax.nn.relu(state @ params["w1"] + params["b1"])
    a = jax.nn.relu(a @ params["w2"] + params["b2"])
    return action_base + max_action * jnp.tanh(a @ params["w3"] + params["b3"])


if __name__ == "__main__":
    key = jax.random.PRNGKey(0)
    kp, ks = jax.random.split(key)

    batch = 8
    state_dim = 16
    act_dim = 4
    action_range = (-1.0, 1.0)

    params = init_actor_params(kp, state_dim, act_dim)
    state = jax.random.normal(ks, (batch, state_dim), jnp.float32)

    ref = actor_ref(state, params, action_range)

    # f32 MXU path: bitwise-close to the reference.
    out_f32 = jax.block_until_ready(
        actor_forward(state, params, action_range, compute_dtype=jnp.float32))
    assert out_f32.shape == (batch, act_dim)
    assert jnp.allclose(out_f32, ref, atol=1e-5, rtol=1e-5)

    # bf16 MXU path (f32 accumulate): wider tolerance vs. the f32 reference.
    out_bf16 = jax.block_until_ready(
        actor_forward(state, params, action_range, compute_dtype=jnp.bfloat16))
    assert out_bf16.shape == (batch, act_dim)
    assert jnp.allclose(out_bf16, ref, atol=2e-2, rtol=2e-2)

    # Larger batch to exercise the batch grid (multiple tiles + padding).
    big_state = jax.random.normal(ks, (300, state_dim), jnp.float32)
    big_out = jax.block_until_ready(
        actor_forward(big_state, params, action_range, compute_dtype=jnp.float32))
    assert big_out.shape == (300, act_dim)
    assert jnp.allclose(big_out, actor_ref(big_state, params, action_range),
                        atol=1e-5, rtol=1e-5)

    print("KERNEL_OK")
</pallas_src>

<mosaic_0001>
module attributes {stable_mosaic.version = 11 : i64} {
  func.func @_actor_kernel(%arg0: i32, %arg1: memref<8x16xf32, #tpu.memory_space<vmem>>, %arg2: memref<16x256xf32, #tpu.memory_space<vmem>>, %arg3: memref<1x256xf32, #tpu.memory_space<vmem>>, %arg4: memref<256x256xf32, #tpu.memory_space<vmem>>, %arg5: memref<1x256xf32, #tpu.memory_space<vmem>>, %arg6: memref<256x128xf32, #tpu.memory_space<vmem>>, %arg7: memref<1x128xf32, #tpu.memory_space<vmem>>, %arg8: memref<8x128xf32, #tpu.memory_space<vmem>>) attributes {dimension_semantics = [#tpu.dimension_semantics<parallel>], iteration_bounds = array<i64: 1>, scalar_prefetch = 0 : i64, scratch_operands = 0 : i64, tpu.core_type = #tpu.core_type<tc>, window_params = [{transform_indices = @transform_0, window_bounds = array<i64: 8, 16>}, {pipeline_mode = #tpu.pipeline_mode<synchronous>, transform_indices = @transform_1, window_bounds = array<i64: 16, 256>}, {pipeline_mode = #tpu.pipeline_mode<synchronous>, transform_indices = @transform_2, window_bounds = array<i64: 1, 256>}, {pipeline_mode = #tpu.pipeline_mode<synchronous>, transform_indices = @transform_3, window_bounds = array<i64: 256, 256>}, {pipeline_mode = #tpu.pipeline_mode<synchronous>, transform_indices = @transform_4, window_bounds = array<i64: 1, 256>}, {pipeline_mode = #tpu.pipeline_mode<synchronous>, transform_indices = @transform_5, window_bounds = array<i64: 256, 128>}, {pipeline_mode = #tpu.pipeline_mode<synchronous>, transform_indices = @transform_6, window_bounds = array<i64: 1, 128>}, {transform_indices = @transform_7, window_bounds = array<i64: 8, 128>}]} {
    %c0 = arith.constant 0 : index
    %c0_0 = arith.constant 0 : index
    %0 = vector.load %arg1[%c0, %c0_0] : memref<8x16xf32, #tpu.memory_space<vmem>>, vector<8x16xf32>
    %c0_1 = arith.constant 0 : index
    %c0_2 = arith.constant 0 : index
    %1 = vector.load %arg2[%c0_1, %c0_2] : memref<16x256xf32, #tpu.memory_space<vmem>>, vector<16x256xf32>
    %cst = arith.constant dense<0.000000e+00> : vector<8x256xf32>
    %2 = tpu.matmul %0, %1, %cst {dimension_numbers = #tpu.dot_dimension_numbers<[1], [0], [0], [1], [0, 0, 1, 1], [], []>} : vector<8x16xf32>, vector<16x256xf32>, vector<8x256xf32> -> vector<8x256xf32>
    %c0_3 = arith.constant 0 : index
    %c0_4 = arith.constant 0 : index
    %3 = vector.load %arg3[%c0_3, %c0_4] : memref<1x256xf32, #tpu.memory_space<vmem>>, vector<1x256xf32>
    %4 = vector.broadcast %3 : vector<1x256xf32> to vector<8x256xf32>
    %5 = arith.addf %2, %4 : vector<8x256xf32>
    %cst_5 = arith.constant 0.000000e+00 : f32
    %6 = vector.broadcast %cst_5 : f32 to vector<8x256xf32>
    %7 = arith.maximumf %5, %6 : vector<8x256xf32>
    %c0_6 = arith.constant 0 : index
    %c0_7 = arith.constant 0 : index
    %8 = vector.load %arg4[%c0_6, %c0_7] : memref<256x256xf32, #tpu.memory_space<vmem>>, vector<256x256xf32>
    %cst_8 = arith.constant dense<0.000000e+00> : vector<8x256xf32>
    %9 = tpu.matmul %7, %8, %cst_8 {dimension_numbers = #tpu.dot_dimension_numbers<[1], [0], [0], [1], [0, 0, 1, 1], [], []>} : vector<8x256xf32>, vector<256x256xf32>, vector<8x256xf32> -> vector<8x256xf32>
    %c0_9 = arith.constant 0 : index
    %c0_10 = arith.constant 0 : index
    %10 = vector.load %arg5[%c0_9, %c0_10] : memref<1x256xf32, #tpu.memory_space<vmem>>, vector<1x256xf32>
    %11 = vector.broadcast %10 : vector<1x256xf32> to vector<8x256xf32>
    %12 = arith.addf %9, %11 : vector<8x256xf32>
    %cst_11 = arith.constant 0.000000e+00 : f32
    %13 = vector.broadcast %cst_11 : f32 to vector<8x256xf32>
    %14 = arith.maximumf %12, %13 : vector<8x256xf32>
    %c0_12 = arith.constant 0 : index
    %c0_13 = arith.constant 0 : index
    %15 = vector.load %arg6[%c0_12, %c0_13] : memref<256x128xf32, #tpu.memory_space<vmem>>, vector<256x128xf32>
    %cst_14 = arith.constant dense<0.000000e+00> : vector<8x128xf32>
    %16 = tpu.matmul %14, %15, %cst_14 {dimension_numbers = #tpu.dot_dimension_numbers<[1], [0], [0], [1], [0, 0, 1, 1], [], []>} : vector<8x256xf32>, vector<256x128xf32>, vector<8x128xf32> -> vector<8x128xf32>
    %c0_15 = arith.constant 0 : index
    %c0_16 = arith.constant 0 : index
    %17 = vector.load %arg7[%c0_15, %c0_16] : memref<1x128xf32, #tpu.memory_space<vmem>>, vector<1x128xf32>
    %18 = vector.broadcast %17 : vector<1x128xf32> to vector<8x128xf32>
    %19 = arith.addf %16, %18 : vector<8x128xf32>
    %20 = math.tanh %19 : vector<8x128xf32>
    %cst_17 = arith.constant 1.000000e+00 : f32
    %21 = vector.broadcast %cst_17 : f32 to vector<8x128xf32>
    %22 = arith.mulf %21, %20 : vector<8x128xf32>
    %cst_18 = arith.constant 0.000000e+00 : f32
    %23 = vector.broadcast %cst_18 : f32 to vector<8x128xf32>
    %24 = arith.addf %23, %22 : vector<8x128xf32>
    %c0_19 = arith.constant 0 : index
    %c0_20 = arith.constant 0 : index
    %25 = vector.load %arg8[%c0_19, %c0_20] : memref<8x128xf32, #tpu.memory_space<vmem>>, vector<8x128xf32>
    tpu.vector_store %arg8[%c0_19, %c0_20], %24 {strides = array<i32>} : memref<8x128xf32, #tpu.memory_space<vmem>>, vector<8x128xf32>,
    return
  }
  func.func @transform_0(%arg0: i32) -> (i32, i32) {
    %c0_i32 = arith.constant 0 : i32
    %c0_i32_0 = arith.constant 0 : i32
    return %arg0, %c0_i32 : i32, i32
  }
  func.func @transform_1(%arg0: i32) -> (i32, i32) {
    %c0_i32 = arith.constant 0 : i32
    %c0_i32_0 = arith.constant 0 : i32
    %c0_i32_1 = arith.constant 0 : i32
    return %c0_i32, %c0_i32_0 : i32, i32
  }
  func.func @transform_2(%arg0: i32) -> (i32, i32) {
    %c0_i32 = arith.constant 0 : i32
    %c0_i32_0 = arith.constant 0 : i32
    %c0_i32_1 = arith.constant 0 : i32
    return %c0_i32, %c0_i32_0 : i32, i32
  }
  func.func @transform_3(%arg0: i32) -> (i32, i32) {
    %c0_i32 = arith.constant 0 : i32
    %c0_i32_0 = arith.constant 0 : i32
    %c0_i32_1 = arith.constant 0 : i32
    return %c0_i32, %c0_i32_0 : i32, i32
  }
  func.func @transform_4(%arg0: i32) -> (i32, i32) {
    %c0_i32 = arith.constant 0 : i32
    %c0_i32_0 = arith.constant 0 : i32
    %c0_i32_1 = arith.constant 0 : i32
    return %c0_i32, %c0_i32_0 : i32, i32
  }
  func.func @transform_5(%arg0: i32) -> (i32, i32) {
    %c0_i32 = arith.constant 0 : i32
    %c0_i32_0 = arith.constant 0 : i32
    %c0_i32_1 = arith.constant 0 : i32
    return %c0_i32, %c0_i32_0 : i32, i32
  }
  func.func @transform_6(%arg0: i32) -> (i32, i32) {
    %c0_i32 = arith.constant 0 : i32
    %c0_i32_0 = arith.constant 0 : i32
    %c0_i32_1 = arith.constant 0 : i32
    return %c0_i32, %c0_i32_0 : i32, i32
  }
  func.func @transform_7(%arg0: i32) -> (i32, i32) {
    %c0_i32 = arith.constant 0 : i32
    %c0_i32_0 = arith.constant 0 : i32
    return %arg0, %c0_i32 : i32, i32
  }
}

</mosaic_0001>

<bundles_post_ra>
// kernel: tpu_custom_call.1
= control target key start
LH: loop header
LB: loop body
LE: loop exit
PB: predicated region body
PF: predicated region fallthrough
CT: control target
= control target key end

     0   :  { %12 = vsyncpa [#allocation3], 0  ;;  %s844_s0 = inlined_call_operand.hbm [shape: f32[8,16], index: 0, kind: input, shape index: {}]   ;;  %s845_s1 = inlined_call_operand.hbm [shape: f32[16,256], index: 1, kind: input, shape index: {}]   ;;  %s846_s2 = inlined_call_operand.vmem [shape: f32[1,256], index: 2, kind: input, shape index: {}]   ;;  %s847_s3 = inlined_call_operand.hbm [shape: f32[256,256], index: 3, kind: input, shape index: {}]   ;;  %s848_s4 = inlined_call_operand.vmem [shape: f32[1,256], index: 4, kind: input, shape index: {}]   ;;  %s849_s5 = inlined_call_operand.hbm [shape: f32[256,128], index: 5, kind: input, shape index: {}]   ;;  %s850_s6 = inlined_call_operand.vmem [shape: f32[1,128], index: 6, kind: input, shape index: {}]   ;;  %s851_s7 = inlined_call_operand.hbm [shape: f32[8,128], index: 7, kind: output, shape index: {}]  }
   0x1   :  { %13 = vsyncpa [#allocation6], 0 }
   0x2   :  { %14 = vsyncpa [#allocation9], 0 }
   0x3   :  { %15 = vsyncpa [#allocation4], 0  ;;  %s719_s24 = smov [#allocation5]   ;;  %s601_s28 = scalar_lea.hbm %s845_s1, 512 }
   0x4   :  { %s31_s25 = sshll.u32 %s719_s24, 4  ;;  %p602_p0 = scmp.ne.s32.totalorder %s845_s1, %s601_s28  ;;  %s32_s25 = int_to_ptr.vmem [resolvable:$true] %s31_s25 }
   0x5   :  { %p605_p1 = scmp.lt.u32.totalorder %s601_s28, %s845_s1 }
   0x7   :  { %p607_p2 = pnand %p605_p1, %p602_p0 }
   0x9   :  { %610 = shalt.err (!%p607_p2)
}
   0xa   :  { %s611_s10 = scalar_lea.vmem %s32_s25, 512  ;;  %p616_p4 = scmp.lt.s32.totalorder %s32_s25, %s32_s25 }
   0xb   :  { %p612_p3 = scmp.ne.s32.totalorder %s32_s25, %s611_s10  ;;  %p617_p5 = scmp.lt.s32.totalorder %s611_s10, %s611_s10 }
   0xd   :  { %p618_p6 = por %p617_p5, %p616_p4 }
   0xf   :  { %p619_p7 = pnand %p618_p6, %p612_p3 }
  0x11   :  { %622 = shalt.err (!%p619_p7)
}
  0x12   :  { %s720_s11 = smov 256   ;;  %s721_s12 = smov 16  }
  0x13   :  { %37 = dma.hbm_to_vmem [thread:$0]  %s845_s1, 512, %s32_s25, [#allocation6], %s720_s11, %s720_s11, %s721_s12  }
  0x14   :  { %s722_s15 = smov [#allocation2]   ;;  %s723_s17 = smov [#allocation7]  }
  0x15   :  { %s22_s16 = sshll.u32 %s722_s15, 4  ;;  %s45_s18 = sshll.u32 %s723_s17, 4  ;;  %s23_s16 = int_to_ptr.vmem [resolvable:$true] %s22_s16  ;;  %s46_s18 = int_to_ptr.vmem [resolvable:$true] %s45_s18 }
  0x16   :  { %s623_s21 = scalar_lea.hbm %s844_s0, 128 }
  0x17   :  { %p624_p8 = scmp.ne.s32.totalorder %s844_s0, %s623_s21  ;;  %p627_p9 = scmp.lt.u32.totalorder %s623_s21, %s844_s0 }
  0x19   :  { %p629_p10 = pnand %p627_p9, %p624_p8 }
  0x1b   :  { %632 = shalt.err (!%p629_p10)
}
  0x1c   :  { %s633_s1 = scalar_lea.vmem %s23_s16, 128  ;;  %p638_p12 = scmp.lt.s32.totalorder %s23_s16, %s23_s16 }
  0x1d   :  { %p634_p11 = scmp.ne.s32.totalorder %s23_s16, %s633_s1  ;;  %p639_p13 = scmp.lt.s32.totalorder %s633_s1, %s633_s1 }
  0x1f   :  { %p640_p0 = por %p639_p13, %p638_p12 }
  0x21   :  { %p641_p1 = pnand %p640_p0, %p634_p11 }
  0x23   :  { %644 = shalt.err (!%p641_p1)
}
  0x24   :  { %25 = dma.hbm_to_vmem [thread:$0]  %s844_s0, 128, %s23_s16, [#allocation3]  }
  0x25   :  { %s645_s30 = scalar_lea.hbm %s847_s3, 8192 }
  0x26   :  { %p646_p2 = scmp.ne.s32.totalorder %s847_s3, %s645_s30  ;;  %p649_p3 = scmp.lt.u32.totalorder %s645_s30, %s847_s3 }
  0x28   :  { %p651_p4 = pnand %p649_p3, %p646_p2 }
  0x2a   :  { %654 = shalt.err (!%p651_p4)
}
  0x2b   :  { %s655_s14 = scalar_lea.vmem %s46_s18, 8192  ;;  %p660_p6 = scmp.lt.s32.totalorder %s46_s18, %s46_s18 }
  0x2c   :  { %p656_p5 = scmp.ne.s32.totalorder %s46_s18, %s655_s14  ;;  %p661_p7 = scmp.lt.s32.totalorder %s655_s14, %s655_s14 }
  0x2e   :  { %p662_p8 = por %p661_p7, %p660_p6 }
  0x30   :  { %p663_p9 = pnand %p662_p8, %p656_p5 }
  0x32   :  { %666 = shalt.err (!%p663_p9)
}
  0x33   :  { %51 = dma.hbm_to_vmem [thread:$0]  %s847_s3, 8192, %s46_s18, [#allocation6], %s720_s11, %s720_s11, %s721_s12  }
  0x34   :  { %s724_s16 = smov [#allocation8]   ;;  %s667_s21 = scalar_lea.hbm %s849_s5, 4096 }
  0x35   :  { %s59_s17 = sshll.u32 %s724_s16, 4  ;;  %p668_p10 = scmp.ne.s32.totalorder %s849_s5, %s667_s21  ;;  %s60_s17 = int_to_ptr.vmem [resolvable:$true] %s59_s17 }
  0x36   :  { %p671_p11 = scmp.lt.u32.totalorder %s667_s21, %s849_s5 }
  0x38   :  { %p673_p12 = pnand %p671_p11, %p668_p10 }
  0x3a   :  { %676 = shalt.err (!%p673_p12)
}
  0x3b   :  { %s677_s1 = scalar_lea.vmem %s60_s17, 4096  ;;  %p682_p0 = scmp.lt.s32.totalorder %s60_s17, %s60_s17 }
  0x3c   :  { %p678_p13 = scmp.ne.s32.totalorder %s60_s17, %s677_s1  ;;  %p683_p1 = scmp.lt.s32.totalorder %s677_s1, %s677_s1 }
  0x3e   :  { %p684_p2 = por %p683_p1, %p682_p0 }
  0x40   :  { %p685_p3 = pnand %p684_p2, %p678_p13 }
  0x42   :  { %688 = shalt.err (!%p685_p3)
}
  0x43   :  { %s725_s3 = smov 128   ;;  %s726_s11 = smov 8  }
  0x44   :  { %65 = dma.hbm_to_vmem [thread:$0]  %s849_s5, 4096, %s60_s17, [#allocation9], %s725_s3, %s725_s3, %s726_s11  }
  0x45   :  { %711 = dma.done.wait [#allocation3], 128  }
  0x46   :  { %712 = vsyncadd [#allocation3], 4294967168 }
  0x47   :  { %713 = dma.done.wait [#allocation6], 8704  }
  0x48   :  { %714 = vsyncadd [#allocation6], 4294958592 }
  0x49   :  { %715 = dma.done.wait [#allocation9], 4096  }
  0x4a   :  { %716 = vsyncadd [#allocation9], 4294963200  ;;  %v727_v0 = vmov 0.0   ;;  %v82_v1 = vld [vmem:[#allocation5 + $0x8] sm:$0xff]  ;;  %v84_v2 = vld [vmem:[#allocation5 + $0x18] sm:$0xff]  ;;  %vm97_vm0 = vcmask 130048  }
  0x4b   :  { %165 = vmatprep.mubr.f32.mxu0 %v727_v0  ;;  %v81_v3 = vld [vmem:[#allocation5] sm:$0xff]  ;;  %v489_v4 = vpack.c.bf16 %v84_v2, %v82_v1  ;;  %v83_v5 = vld [vmem:[#allocation5 + $0x10] sm:$0xff]  ;;  %v175_v6 = vld [vmem:[#allocation7 + $0x8] sm:$0xff] }
  0x4c   :  { %v491_v7 = vpack.c.bf16 %v83_v5, %v81_v3  ;;  %v80_v8 = vld [vmem:[#allocation2] sm:$0xff]  ;;  %v174_v10 = vld [vmem:[#allocation7] sm:$0xff]  ;;  %v176_v11 = vld [vmem:[#allocation7 + $0x10] sm:$0xff] }
  0x4d   :  { %v177_v9 = vld [vmem:[#allocation7 + $0x18] sm:$0xff]  ;;  %490 = vmatprep.subr.bf16.mxu0 %v489_v4  ;;  %v495_v13 = vpack.c.bf16 %v176_v11, %v174_v10  ;;  %v179_v14 = vld [vmem:[#allocation7 + $0x28] sm:$0xff]  ;;  %v178_v16 = vld [vmem:[#allocation7 + $0x20] sm:$0xff] }
  0x4e   :  { %v493_v12 = vpack.c.bf16 %v177_v9, %v175_v6  ;;  %v181_v15 = vld [vmem:[#allocation7 + $0x38] sm:$0xff]  ;;  %492 = vmatpush1.bf16.msra.mxu0 %v491_v7  ;;  %v180_v18 = vld [vmem:[#allocation7 + $0x30] sm:$0xff]  ;;  %v183_v19 = vld [vmem:[#allocation7 + $0x48] sm:$0xff] }
  0x4f   :  { %v497_v17 = vpack.c.bf16 %v181_v15, %v179_v14  ;;  %v185_v20 = vld [vmem:[#allocation7 + $0x58] sm:$0xff]  ;;  %v499_v21 = vpack.c.bf16 %v180_v18, %v178_v16  ;;  %v182_v23 = vld [vmem:[#allocation7 + $0x40] sm:$0xff]  ;;  %v184_v24 = vld [vmem:[#allocation7 + $0x50] sm:$0xff] }
  0x50   :  { %494 = vmatprep.subr.bf16.mxu1 %v493_v12  ;;  %v501_v22 = vpack.c.bf16 %v185_v20, %v183_v19  ;;  %v187_v25 = vld [vmem:[#allocation7 + $0x68] sm:$0xff]  ;;  %v189_v26 = vld [vmem:[#allocation7 + $0x78] sm:$0xff]  ;;  %v503_v27 = vpack.c.bf16 %v184_v24, %v182_v23  ;;  %v186_v29 = vld [vmem:[#allocation7 + $0x60] sm:$0xff] }
  0x51   :  { %496 = vmatpush1.bf16.msra.mxu1 %v495_v13  ;;  %452 = vmatmul.mubr.msk.f32.vlgmr.msra.gmra.mrb[0].mxu0 %vm97_vm0, %v80_v8  ;;  %v505_v28 = vpack.c.bf16 %v189_v26, %v187_v25  ;;  %v188_v30 = vld [vmem:[#allocation7 + $0x70] sm:$0xff]  ;;  %v191_v31 = vld [vmem:[#allocation7 + $0x88] sm:$0xff]  ;;  %v193_v32 = vld [vmem:[#allocation7 + $0x98] sm:$0xff] }
  0x52   :  { %498 = vmatprep.subr.bf16.mxu1 %v497_v17  ;;  %v507_v33 = vpack.c.bf16 %v188_v30, %v186_v29  ;;  %v509_v34 = vpack.c.bf16 %v193_v32, %v191_v31  ;;  %v190_v35 = vld [vmem:[#allocation7 + $0x80] sm:$0xff]  ;;  %v192_v36 = vld [vmem:[#allocation7 + $0x90] sm:$0xff]  ;;  %v195_v37 = vld [vmem:[#allocation7 + $0xa8] sm:$0xff] }
  0x53   :  { %v197_v38 = vld [vmem:[#allocation7 + $0xb8] sm:$0xff]  ;;  %v511_v39 = vpack.c.bf16 %v192_v36, %v190_v35  ;;  %v194_v41 = vld [vmem:[#allocation7 + $0xa0] sm:$0xff]  ;;  %v196_v42 = vld [vmem:[#allocation7 + $0xb0] sm:$0xff] }
  0x54   :  { %v513_v40 = vpack.c.bf16 %v197_v38, %v195_v37  ;;  %v199_v43 = vld [vmem:[#allocation7 + $0xc8] sm:$0xff]  ;;  %v201_v44 = vld [vmem:[#allocation7 + $0xd8] sm:$0xff]  ;;  %v515_v45 = vpack.c.bf16 %v196_v42, %v194_v41  ;;  %v198_v47 = vld [vmem:[#allocation7 + $0xc0] sm:$0xff] }
  0x55   :  { %500 = vmatpush1.bf16.msra.mxu1 %v499_v21  ;;  %v517_v46 = vpack.c.bf16 %v201_v44, %v199_v43  ;;  %v200_v48 = vld [vmem:[#allocation7 + $0xd0] sm:$0xff]  ;;  %v203_v49 = vld [vmem:[#allocation7 + $0xe8] sm:$0xff]  ;;  %v205_v50 = vld [vmem:[#allocation7 + $0xf8] sm:$0xff] }
  0x56   :  { %502 = vmatprep.subr.bf16.mxu1 %v501_v22  ;;  %v519_v51 = vpack.c.bf16 %v200_v48, %v198_v47  ;;  %v521_v52 = vpack.c.bf16 %v205_v50, %v203_v49  ;;  %v202_v53 = vld [vmem:[#allocation7 + $0xe0] sm:$0xff]  ;;  %v204_v54 = vld [vmem:[#allocation7 + $0xf0] sm:$0xff]  ;;  %v207_v55 = vld [vmem:[#allocation7 + $0x108] sm:$0xff] }
  0x57   :  { %v209_v56 = vld [vmem:[#allocation7 + $0x118] sm:$0xff]  ;;  %v523_v57 = vpack.c.bf16 %v204_v54, %v202_v53  ;;  %v206_v59 = vld [vmem:[#allocation7 + $0x100] sm:$0xff]  ;;  %v208_v60 = vld [vmem:[#allocation7 + $0x110] sm:$0xff] }
  0x58   :  { %v525_v58 = vpack.c.bf16 %v209_v56, %v207_v55  ;;  %v211_v61 = vld [vmem:[#allocation7 + $0x128] sm:$0xff]  ;;  %v213_v62 = vld [vmem:[#allocation7 + $0x138] sm:$0xff]  ;;  %v527_v63 = vpack.c.bf16 %v208_v60, %v206_v59  ;;  %v210_v1 = vld [vmem:[#allocation7 + $0x120] sm:$0xff] }
  0x59   :  { %504 = vmatpush1.bf16.msra.mxu1 %v503_v27  ;;  %v529_v0 = vpack.c.bf16 %v213_v62, %v211_v61  ;;  %v212_v2 = vld [vmem:[#allocation7 + $0x130] sm:$0xff]  ;;  %v215_v3 = vld [vmem:[#allocation7 + $0x148] sm:$0xff]  ;;  %v217_v4 = vld [vmem:[#allocation7 + $0x158] sm:$0xff] }
  0x5a   :  { %506 = vmatprep.subr.bf16.mxu1 %v505_v28  ;;  %v531_v5 = vpack.c.bf16 %v212_v2, %v210_v1  ;;  %v533_v6 = vpack.c.bf16 %v217_v4, %v215_v3  ;;  %v214_v7 = vld [vmem:[#allocation7 + $0x140] sm:$0xff]  ;;  %v216_v8 = vld [vmem:[#allocation7 + $0x150] sm:$0xff]  ;;  %v219_v9 = vld [vmem:[#allocation7 + $0x168] sm:$0xff] }
  0x5b   :  { %v221_v10 = vld [vmem:[#allocation7 + $0x178] sm:$0xff]  ;;  %v535_v11 = vpack.c.bf16 %v216_v8, %v214_v7  ;;  %v218_v13 = vld [vmem:[#allocation7 + $0x160] sm:$0xff]  ;;  %v220_v14 = vld [vmem:[#allocation7 + $0x170] sm:$0xff] }
  0x5c   :  { %v537_v12 = vpack.c.bf16 %v221_v10, %v219_v9  ;;  %v223_v15 = vld [vmem:[#allocation7 + $0x188] sm:$0xff]  ;;  %v225_v16 = vld [vmem:[#allocation7 + $0x198] sm:$0xff]  ;;  %v539_v17 = vpack.c.bf16 %v220_v14, %v218_v13  ;;  %v222_v19 = vld [vmem:[#allocation7 + $0x180] sm:$0xff] }
  0x5d   :  { %508 = vmatpush1.bf16.msra.mxu1 %v507_v33  ;;  %v541_v18 = vpack.c.bf16 %v225_v16, %v223_v15  ;;  %v224_v20 = vld [vmem:[#allocation7 + $0x190] sm:$0xff]  ;;  %v227_v21 = vld [vmem:[#allocation7 + $0x1a8] sm:$0xff]  ;;  %v229_v22 = vld [vmem:[#allocation7 + $0x1b8] sm:$0xff]  ;;  %v87_v15 = vlaneseq }
  0x5e   :  { %510 = vmatprep.subr.bf16.mxu1 %v509_v34  ;;  %v543_v23 = vpack.c.bf16 %v224_v20, %v222_v19  ;;  %v545_v24 = vpack.c.bf16 %v229_v22, %v227_v21  ;;  %v226_v25 = vld [vmem:[#allocation7 + $0x1a0] sm:$0xff]  ;;  %v228_v26 = vld [vmem:[#allocation7 + $0x1b0] sm:$0xff]  ;;  %v231_v27 = vld [vmem:[#allocation7 + $0x1c8] sm:$0xff] }
  0x5f   :  { %v233_v28 = vld [vmem:[#allocation7 + $0x1d8] sm:$0xff]  ;;  %v547_v29 = vpack.c.bf16 %v228_v26, %v226_v25  ;;  %v230_v31 = vld [vmem:[#allocation7 + $0x1c0] sm:$0xff]  ;;  %v232_v32 = vld [vmem:[#allocation7 + $0x1d0] sm:$0xff]  ;;  %v88_v16 = vshrl.u32 %v87_v15, 7 }
  0x60   :  { %v549_v30 = vpack.c.bf16 %v233_v28, %v231_v27  ;;  %v551_v33 = vpack.c.bf16 %v232_v32, %v230_v31  ;;  %v235_v34 = vld [vmem:[#allocation7 + $0x1e8] sm:$0xff]  ;;  %v237_v35 = vld [vmem:[#allocation7 + $0x1f8] sm:$0xff]  ;;  %v234_v37 = vld [vmem:[#allocation7 + $0x1e0] sm:$0xff] }
  0x61   :  { %512 = vmatpush1.bf16.msra.mxu1 %v511_v39  ;;  %v553_v36 = vpack.c.bf16 %v237_v35, %v235_v34  ;;  %v236_v38 = vld [vmem:[#allocation7 + $0x1f0] sm:$0xff]  ;;  %v340_v41 = vld [vmem:[#allocation8 + $0x88] sm:$0xff]  ;;  %v323_v42 = vld [vmem:[#allocation8] sm:$0xff]  ;;  %v93_v19 = vsub.s32 1, %v88_v16 }
  0x62   :  { %514 = vmatprep.subr.bf16.mxu1 %v513_v40  ;;  %v555_v39 = vpack.c.bf16 %v236_v38, %v234_v37  ;;  %v339_v40 = vld [vmem:[#allocation8 + $0x80] sm:$0xff]  ;;  %v324_v44 = vld [vmem:[#allocation8 + $0x8] sm:$0xff]  ;;  %v325_v49 = vld [vmem:[#allocation8 + $0x10] sm:$0xff] }
  0x63   :  { %v557_v43 = vpack.c.bf16 %v340_v41, %v339_v40  ;;  %v559_v47 = vpack.c.bf16 %v324_v44, %v323_v42  ;;  %v326_v50 = vld [vmem:[#allocation8 + $0x18] sm:$0xff]  ;;  %v327_v55 = vld [vmem:[#allocation8 + $0x20] sm:$0xff]  ;;  %v328_v56 = vld [vmem:[#allocation8 + $0x28] sm:$0xff] }
  0x64   :  { %v563_v53 = vpack.c.bf16 %v326_v50, %v325_v49  ;;  %v567_v59 = vpack.c.bf16 %v328_v56, %v327_v55  ;;  %v329_v61 = vld [vmem:[#allocation8 + $0x30] sm:$0xff]  ;;  %v330_v62 = vld [vmem:[#allocation8 + $0x38] sm:$0xff]  ;;  %v331_v3 = vld [vmem:[#allocation8 + $0x40] sm:$0xff] }
  0x65   :  { %516 = vmatpush1.bf16.msra.mxu1 %v515_v45  ;;  %v341_v45 = vld [vmem:[#allocation8 + $0x90] sm:$0xff]  ;;  %558 = vmatprep.subr.bf16.mxu0 %v557_v43  ;;  %v571_v1 = vpack.c.bf16 %v330_v62, %v329_v61  ;;  %v332_v4 = vld [vmem:[#allocation8 + $0x48] sm:$0xff]  ;;  %v334_v10 = vld [vmem:[#allocation8 + $0x58] sm:$0xff] }
  0x66   :  { %518 = vmatprep.subr.bf16.mxu1 %v517_v46  ;;  %v342_v46 = vld [vmem:[#allocation8 + $0x98] sm:$0xff]  ;;  %560 = vmatpush3.bf16.msra.mxu0 %v559_v47  ;;  %v575_v7 = vpack.c.bf16 %v332_v4, %v331_v3  ;;  %v333_v9 = vld [vmem:[#allocation8 + $0x50] sm:$0xff]  ;;  %v335_v28 = vld [vmem:[#allocation8 + $0x60] sm:$0xff] }
  0x67   :  { %v561_v48 = vpack.c.bf16 %v342_v46, %v341_v45  ;;  %v579_v13 = vpack.c.bf16 %v334_v10, %v333_v9  ;;  %v353_v31 = vld [vmem:[#allocation8 + $0xf0] sm:$0xff]  ;;  %v354_v32 = vld [vmem:[#allocation8 + $0xf8] sm:$0xff] }
  0x68   :  { %v337_v34 = vld [vmem:[#allocation8 + $0x70] sm:$0xff]  ;;  %v338_v35 = vld [vmem:[#allocation8 + $0x78] sm:$0xff] }
  0x69   :  { %520 = vmatpush1.bf16.msra.mxu1 %v519_v51  ;;  %v343_v51 = vld [vmem:[#allocation8 + $0xa0] sm:$0xff]  ;;  %562 = vmatprep.subr.bf16.mxu0 %v561_v48  ;;  %v238_v37 = vld [vmem:[%s848_s4] sm:$0x3]  ;;  %s728_s4 = smov [#allocation10]  }
  0x6a   :  { %522 = vmatprep.subr.bf16.mxu1 %v521_v52  ;;  %v344_v52 = vld [vmem:[#allocation8 + $0xa8] sm:$0xff]  ;;  %564 = vmatpush3.bf16.msra.mxu0 %v563_v53  ;;  %v453_v47 = vld [vmem:[%s850_s6] ss:$0 sm:$0xff]  ;;  %s441_s30 = sshll.u32 %s728_s4, 4  ;;  %s442_s30 = int_to_ptr.vmem [resolvable:$true] %s441_s30 }
  0x6b   :  { %v565_v54 = vpack.c.bf16 %v344_v52, %v343_v51  ;;  %s689_s8 = scalar_lea.vmem %s442_s30, 128  ;;  %p694_p5 = scmp.lt.s32.totalorder %s442_s30, %s442_s30 }
  0x6c   :  { %p690_p4 = scmp.ne.s32.totalorder %s442_s30, %s689_s8  ;;  %p695_p6 = scmp.lt.s32.totalorder %s689_s8, %s689_s8 }
  0x6d   :  { %524 = vmatpush1.bf16.msra.mxu1 %v523_v57  ;;  %v345_v57 = vld [vmem:[#allocation8 + $0xb0] sm:$0xff]  ;;  %566 = vmatprep.subr.bf16.mxu0 %v565_v54 }
  0x6e   :  { %526 = vmatprep.subr.bf16.mxu1 %v525_v58  ;;  %v346_v58 = vld [vmem:[#allocation8 + $0xb8] sm:$0xff]  ;;  %568 = vmatpush3.bf16.msra.mxu0 %v567_v59  ;;  %p696_p7 = por %p695_p6, %p694_p5 }
  0x6f   :  { %v569_v60 = vpack.c.bf16 %v346_v58, %v345_v57 }
  0x70   :  { %p697_p8 = pnand %p696_p7, %p690_p4 }
  0x71   :  { %528 = vmatpush1.bf16.msra.mxu1 %v527_v63  ;;  %v347_v63 = vld [vmem:[#allocation8 + $0xc0] sm:$0xff]  ;;  %570 = vmatprep.subr.bf16.mxu0 %v569_v60 }
  0x72   :  { %530 = vmatprep.subr.bf16.mxu1 %v529_v0  ;;  %v348_v0 = vld [vmem:[#allocation8 + $0xc8] sm:$0xff]  ;;  %572 = vmatpush3.bf16.msra.mxu0 %v571_v1 }
  0x73   :  { %v573_v2 = vpack.c.bf16 %v348_v0, %v347_v63 }
  0x75   :  { %532 = vmatpush1.bf16.msra.mxu1 %v531_v5  ;;  %v349_v5 = vld [vmem:[#allocation8 + $0xd0] sm:$0xff]  ;;  %574 = vmatprep.subr.bf16.mxu0 %v573_v2 }
  0x76   :  { %534 = vmatprep.subr.bf16.mxu1 %v533_v6  ;;  %v350_v6 = vld [vmem:[#allocation8 + $0xd8] sm:$0xff]  ;;  %576 = vmatpush3.bf16.msra.mxu0 %v575_v7 }
  0x77   :  { %v577_v8 = vpack.c.bf16 %v350_v6, %v349_v5 }
  0x79   :  { %536 = vmatpush1.bf16.msra.mxu1 %v535_v11  ;;  %v351_v11 = vld [vmem:[#allocation8 + $0xe0] sm:$0xff]  ;;  %578 = vmatprep.subr.bf16.mxu0 %v577_v8 }
  0x7a   :  { %538 = vmatprep.subr.bf16.mxu1 %v537_v12  ;;  %v352_v12 = vld [vmem:[#allocation8 + $0xe8] sm:$0xff]  ;;  %580 = vmatpush3.bf16.msra.mxu0 %v579_v13 }
  0x7b   :  { %v581_v14 = vpack.c.bf16 %v352_v12, %v351_v11 }
  0x7d   :  { %540 = vmatpush1.bf16.msra.mxu1 %v539_v17  ;;  %582 = vmatprep.subr.bf16.mxu0 %v581_v14  ;;  %v89_v17 = vsub.s32 0, %v88_v16 }
  0x7e   :  { %542 = vmatprep.subr.bf16.mxu1 %v541_v18  ;;  %v85_v18 = vld [vmem:[%s846_s2] sm:$0x3] }
  0x7f   :  { %v90_v20 = vrot.slane %v85_v18, %v89_v17  ;;  %v94_v21 = vrot.slane %v85_v18, %v93_v19  ;;  %v243_v38 = vrot.slane %v238_v37, %v89_v17 }
  0x81   :  { %544 = vmatpush1.bf16.msra.mxu1 %v543_v23 }
  0x82   :  { %546 = vmatprep.subr.bf16.mxu1 %v545_v24 }
  0x85   :  { %548 = vmatpush1.bf16.msra.mxu1 %v547_v29  ;;  %v336_v29 = vld [vmem:[#allocation8 + $0x68] sm:$0xff] }
  0x86   :  { %550 = vmatprep.subr.bf16.mxu1 %v549_v30  ;;  %v583_v30 = vpack.c.bf16 %v336_v29, %v335_v28 }
  0x88   :  { %584 = vmatpush3.bf16.msra.mxu0 %v583_v30 }
  0x89   :  { %552 = vmatpush1.bf16.msra.mxu1 %v551_v33  ;;  %v585_v33 = vpack.c.bf16 %v354_v32, %v353_v31 }
  0x8a   :  { %554 = vmatprep.subr.bf16.mxu1 %v553_v36  ;;  %v587_v36 = vpack.c.bf16 %v338_v35, %v337_v34 }
  0x8b   :  { %586 = vmatprep.subr.bf16.mxu0 %v585_v33 }
  0x8c   :  { %588 = vmatpush3.bf16.msra.mxu0 %v587_v36 }
  0x8d   :  { %556 = vmatpush1.bf16.msra.mxu1 %v555_v39  ;;  %v247_v39 = vrot.slane %v238_v37, %v93_v19 }
 0x124   :  { %v167_v22 = vpop.f32.mrb[0].mxu0 }
 0x125   :  { %v168_v23 = vadd.f32 %v167_v22, %v90_v20  ;;  %v169_v24 = vpop.f32.mrb[1].mxu0 }
 0x126   :  { %v170_v25 = vadd.f32 %v169_v24, %v94_v21 }
 0x127   :  { %v172_v27 = vmax.f32 %v168_v23, 0.0 }
 0x128   :  { %v173_v26 = vmax.f32 %v170_v25, 0.0 }
 0x12a   :  { %314 = vmatprep.mubr.f32.mxu1 %v173_v26 }
 0x12b   :  { %315 = vmatmul.mubr.f32.vlgmr.msra.gmra.mrb[0].mxu1 %v172_v27 }
 0x1fe   :  { %v316_v40 = vpop.f32.mrb[0].mxu1 }
 0x1ff   :  { %v317_v41 = vadd.f32 %v316_v40, %v243_v38  ;;  %v318_v42 = vpop.f32.mrb[1].mxu1 }
 0x200   :  { %v319_v43 = vadd.f32 %v318_v42, %v247_v39 }
 0x201   :  { %v321_v45 = vmax.f32 %v317_v41, 0.0 }
 0x202   :  { %v322_v44 = vmax.f32 %v319_v43, 0.0 }
 0x204   :  { %426 = vmatprep.mubr.f32.mxu0 %v322_v44 }
 0x205   :  { %427 = vmatmul.mubr.f32.vlgmr.msra.gmra.mrb[2].mxu0 %v321_v45 }
 0x2d8   :  { %v486_v46 = vpop.f32.mrb[2].mxu0 }
 0x2d9   :  { %v487_v48 = vpop.f32.mrb[3].mxu0 }
 0x2da   :  { %v488_v49 = vadd.f32 %v487_v48, %v486_v46 }
 0x2dc   :  { %v429_v50 = vadd.f32 %v488_v49, %v453_v47 }
 0x2de   :  { %599 = vtanh.f32 %v429_v50 }
 0x2e8   :  { %v600_v51 = vpop.eup %599 }
 0x2e9   :  { %434 = vst [vmem:[#allocation10] sm:$0xff] %v600_v51 }
 0x2ea   :  { %700 = shalt.err (!%p697_p8)
}
 0x2eb   :  { %s701_s6 = scalar_lea.hbm %s851_s7, 128 }
 0x2ec   :  { %p702_p9 = scmp.ne.s32.totalorder %s851_s7, %s701_s6  ;;  %p705_p10 = scmp.lt.u32.totalorder %s701_s6, %s851_s7 }
 0x2ee   :  { %p707_p11 = pnand %p705_p10, %p702_p9 }
 0x2f0   :  { %710 = shalt.err (!%p707_p11)
}
 0x2f1   :  { %444 = dma.vmem_to_hbm [thread:$0]  %s442_s30, 128, %s851_s7, [#allocation4]  }
 0x2f2   :  { %717 = dma.done.wait [#allocation4], 128  }
 0x2f3   :  { %718 = vsyncadd [#allocation4], 4294967168 }
 0x2f4   :  { %448 = vsyncpa [#allocation3], 1 }
 0x2f5   :  { %449 = vsyncpa [#allocation6], 1 }
 0x2f6   :  { %450 = vsyncpa [#allocation9], 1 }
 0x2f7   :  { %451 = vsyncpa [#allocation4], 1 }

</bundles_post_ra>
